<compile_context>
chip_gen: v5e
topology: v5e:2x2
jax: 0.10.0
libtpu: 0.0.40
codegen_flags: <defaults>
</compile_context>

<pallas_src>
import functools

import jax
import jax.numpy as jnp
from jax.experimental import pallas as pl
from jax.experimental.pallas import tpu as pltpu


def _encoder_kernel(x_ref, p_ref, out_ref, *, seq_len, feature_dim, emb_dim):
    """Grid-less kernel; every ref lives fully in VMEM.

    x_ref   : (N, F)            input features (seq-major, batch squeezed)
    p_ref   : (2E + Tpad, 3E)   packed parameters:
                rows [0, E)      : W_ih  (E, 3E)  gate order r|z|n
                rows [E, 2E)     : W_hh  (E, 3E)
                rows 2E + 0      : b_gx = b_ih + [b_hh_r | b_hh_z | 0]
                rows 2E + 1      : b_gh = [0 | 0 | b_hh_n]
                rows 2E + 2 ..   : W_emb (F, E)  (cols E..3E zero-padded)
                next row         : b_emb (1, E)  (cols E..3E zero-padded)
                remaining rows   : zero padding to a multiple of 8
    out_ref : (N, E)            per-step hidden states (row N-1 == final h)
    """
    E = emb_dim
    F = feature_dim
    G = 3 * E

    # ---- unpack parameters (static, sublane-aligned slices; loaded once) ----
    w_ih = p_ref[0:E, :]                       # (E, 3E)
    w_hh = p_ref[E:2 * E, :]                   # (E, 3E)
    tail = p_ref[2 * E:, :]                    # aligned tail block
    b_gx = tail[0:1, :]                        # (1, 3E)
    b_gh = tail[1:2, :]                        # (1, 3E)
    w_emb = tail[2:2 + F, 0:E]                 # (F, E)
    b_emb = tail[2 + F:3 + F, 0:E]             # (1, E)

    # ---- embedding + ReLU ----
    emb = jnp.maximum(
        jnp.dot(x_ref[...], w_emb, preferred_element_type=jnp.float32) + b_emb,
        0.0,
    )                                          # (N, E)

    # ---- fused x-side gate pre-activations for all timesteps ----
    gx = jnp.dot(emb, w_ih, preferred_element_type=jnp.float32) + b_gx   # (N, 3E)

    # ---- sequential GRU recurrence, statically unrolled (h0 = zeros) ----
    h = jnp.zeros((1, E), jnp.float32)
    for t in range(seq_len):                   # static unroll (N = 8)
        # single fused hidden-side matmul per step: (1,E) @ (E,3E)
        gh = jnp.dot(h, w_hh, preferred_element_type=jnp.float32) + b_gh  # (1, 3E)
        # one sigmoid push covers the adjacent r|z lanes
        rz = jax.nn.sigmoid(gx[t:t + 1, 0:2 * E] + gh[:, 0:2 * E])        # (1, 2E)
        r = rz[:, 0:E]
        z = rz[:, E:2 * E]
        # gh[:, 2E:] already contains b_hh_n -> stays inside the r-gating
        n = jnp.tanh(gx[t:t + 1, 2 * E:G] + r * gh[:, 2 * E:G])
        h = (1.0 - z) * n + z * h
        out_ref[t:t + 1, :] = h                # per-step row store


def _pack_params(params, feature_dim, emb_dim):
    """Pack Linear + GRU parameters into one (2E + Tpad, 3E) f32 slab."""
    E, F, G = emb_dim, feature_dim, 3 * emb_dim
    b_ih = params["b_ih"]                                      # (1, 3E)
    b_hh = params["b_hh"]                                      # (1, 3E)
    # b_hh_r / b_hh_z sit outside the r-gating -> fold into the x-side bias.
    b_gx = jnp.concatenate(
        [b_ih[:, :2 * E] + b_hh[:, :2 * E], b_ih[:, 2 * E:]], axis=1)     # (1, 3E)
    # b_hh_n must stay with the hidden-side n pre-activation.
    b_gh = jnp.concatenate(
        [jnp.zeros((1, 2 * E), jnp.float32), b_hh[:, 2 * E:]], axis=1)    # (1, 3E)
    w_emb = jnp.pad(params["w_emb"], ((0, 0), (0, G - E)))                # (F, 3E)
    b_emb = jnp.pad(params["b_emb"], ((0, 0), (0, G - E)))                # (1, 3E)
    tail = jnp.concatenate([b_gx, b_gh, w_emb, b_emb], axis=0)            # (2+F+1, 3E)
    pad = (-tail.shape[0]) % 8
    if pad:
        tail = jnp.pad(tail, ((0, pad), (0, 0)))
    packed = jnp.concatenate([params["w_ih"], params["w_hh"], tail], axis=0)
    return packed


def encoder_forward(x, params):
    """x: (1, N, F) float32. Returns (outputs (N,1,E), hidden (1,1,E))."""
    _, N, F = x.shape
    E = params["w_emb"].shape[1]
    x2 = x[0]                                   # permute(1,0,2) + squeeze batch

    packed = _pack_params(params, F, E)

    kernel = functools.partial(_encoder_kernel, seq_len=N, feature_dim=F, emb_dim=E)
    outputs = pl.pallas_call(
        kernel,
        out_shape=jax.ShapeDtypeStruct((N, E), jnp.float32),
        in_specs=[pl.BlockSpec(memory_space=pltpu.MemorySpace.VMEM)] * 2,
        out_specs=pl.BlockSpec(memory_space=pltpu.MemorySpace.VMEM),
    )(x2, packed)

    hidden = outputs[-1:, :]                    # final hidden state == last row
    return outputs[:, None, :], hidden[None, :, :]


def encoder_reference(x, params):
    """Pure-JAX reference matching torch.nn.Linear + ReLU + torch.nn.GRU."""
    x2 = x[0]
    E = params["w_emb"].shape[1]
    emb = jnp.maximum(x2 @ params["w_emb"] + params["b_emb"], 0.0)  # (N, E)
    gx = emb @ params["w_ih"] + params["b_ih"]                      # (N, 3E)

    def step(h, gx_t):
        gh = h @ params["w_hh"] + params["b_hh"]
        r = jax.nn.sigmoid(gx_t[:, 0:E] + gh[:, 0:E])
        z = jax.nn.sigmoid(gx_t[:, E:2 * E] + gh[:, E:2 * E])
        n = jnp.tanh(gx_t[:, 2 * E:3 * E] + r * gh[:, 2 * E:3 * E])
        h_new = (1.0 - z) * n + z * h
        return h_new, h_new[0]

    h0 = jnp.zeros((1, E), jnp.float32)
    h_fin, outs = jax.lax.scan(step, h0, gx[:, None, :])
    return outs[:, None, :], h_fin[None, :, :]


def init_params(key, feature_dim, emb_dim):
    """Deterministic synthetic params, stored pre-transposed for the kernel."""
    ks = jax.random.split(key, 6)
    s = 0.1
    return {
        # torch: emb.weight (E, F) -> stored (F, E)
        "w_emb": s * jax.random.normal(ks[0], (feature_dim, emb_dim), jnp.float32),
        "b_emb": s * jax.random.normal(ks[1], (1, emb_dim), jnp.float32),
        # torch: weight_ih_l0 (3E, E) -> stored (E, 3E); gate order r, z, n
        "w_ih": s * jax.random.normal(ks[2], (emb_dim, 3 * emb_dim), jnp.float32),
        "b_ih": s * jax.random.normal(ks[3], (1, 3 * emb_dim), jnp.float32),
        "w_hh": s * jax.random.normal(ks[4], (emb_dim, 3 * emb_dim), jnp.float32),
        "b_hh": s * jax.random.normal(ks[5], (1, 3 * emb_dim), jnp.float32),
    }


if __name__ == "__main__":
    key = jax.random.PRNGKey(0)
    k_x, k_p = jax.random.split(key)

    v_net_node_num = 8      # sequence length N
    v_net_feature_dim = 4   # F
    embedding_dim = 32      # E

    x = jax.random.normal(k_x, (1, v_net_node_num, v_net_feature_dim), jnp.float32)
    params = init_params(k_p, v_net_feature_dim, embedding_dim)

    outputs, hidden = encoder_forward(x, params)
    outputs = jax.block_until_ready(outputs)
    hidden = jax.block_until_ready(hidden)

    ref_out, ref_hid = encoder_reference(x, params)

    assert outputs.shape == (v_net_node_num, 1, embedding_dim)
    assert hidden.shape == (1, 1, embedding_dim)
    assert jnp.allclose(outputs, ref_out, atol=1e-5, rtol=1e-5)
    assert jnp.allclose(hidden, ref_hid, atol=1e-5, rtol=1e-5)

    print("KERNEL_OK")
</pallas_src>

<mosaic_0001>
module attributes {stable_mosaic.version = 11 : i64} {
  func.func @_encoder_kernel(%arg0: memref<8x4xf32, #tpu.memory_space<vmem>>, %arg1: memref<72x96xf32, #tpu.memory_space<vmem>>, %arg2: memref<8x32xf32, #tpu.memory_space<vmem>>) attributes {dimension_semantics = [], scalar_prefetch = 0 : i64, scratch_operands = 0 : i64, tpu.core_type = #tpu.core_type<tc>} {
    %c0 = arith.constant 0 : index
    %c0_0 = arith.constant 0 : index
    %0 = vector.load %arg1[%c0, %c0_0] : memref<72x96xf32, #tpu.memory_space<vmem>>, vector<32x96xf32>
    %c32 = arith.constant 32 : index
    %c0_1 = arith.constant 0 : index
    %1 = vector.load %arg1[%c32, %c0_1] : memref<72x96xf32, #tpu.memory_space<vmem>>, vector<32x96xf32>
    %c64 = arith.constant 64 : index
    %c0_2 = arith.constant 0 : index
    %2 = vector.load %arg1[%c64, %c0_2] : memref<72x96xf32, #tpu.memory_space<vmem>>, vector<8x96xf32>
    %3 = vector.extract_strided_slice %2 {offsets = [0, 0], sizes = [1, 96], strides = [1, 1]} : vector<8x96xf32> to vector<1x96xf32>
    %4 = vector.extract_strided_slice %2 {offsets = [1, 0], sizes = [1, 96], strides = [1, 1]} : vector<8x96xf32> to vector<1x96xf32>
    %5 = vector.extract_strided_slice %2 {offsets = [2, 0], sizes = [4, 32], strides = [1, 1]} : vector<8x96xf32> to vector<4x32xf32>
    %6 = vector.extract_strided_slice %2 {offsets = [6, 0], sizes = [1, 32], strides = [1, 1]} : vector<8x96xf32> to vector<1x32xf32>
    %c0_3 = arith.constant 0 : index
    %c0_4 = arith.constant 0 : index
    %7 = vector.load %arg0[%c0_3, %c0_4] : memref<8x4xf32, #tpu.memory_space<vmem>>, vector<8x4xf32>
    %cst = arith.constant dense<0.000000e+00> : vector<8x32xf32>
    %8 = tpu.matmul %7, %5, %cst {dimension_numbers = #tpu.dot_dimension_numbers<[1], [0], [0], [1], [0, 0, 1, 1], [], []>} : vector<8x4xf32>, vector<4x32xf32>, vector<8x32xf32> -> vector<8x32xf32>
    %9 = vector.broadcast %6 : vector<1x32xf32> to vector<8x32xf32>
    %10 = arith.addf %8, %9 : vector<8x32xf32>
    %cst_5 = arith.constant 0.000000e+00 : f32
    %11 = vector.broadcast %cst_5 : f32 to vector<8x32xf32>
    %12 = arith.maximumf %10, %11 : vector<8x32xf32>
    %cst_6 = arith.constant dense<0.000000e+00> : vector<8x96xf32>
    %13 = tpu.matmul %12, %0, %cst_6 {dimension_numbers = #tpu.dot_dimension_numbers<[1], [0], [0], [1], [0, 0, 1, 1], [], []>} : vector<8x32xf32>, vector<32x96xf32>, vector<8x96xf32> -> vector<8x96xf32>
    %14 = vector.broadcast %3 : vector<1x96xf32> to vector<8x96xf32>
    %15 = arith.addf %13, %14 : vector<8x96xf32>
    %cst_7 = arith.constant 0.000000e+00 : f32
    %16 = vector.broadcast %cst_7 : f32 to vector<1x32xf32>
    %cst_8 = arith.constant dense<0.000000e+00> : vector<1x96xf32>
    %17 = tpu.matmul %16, %1, %cst_8 {dimension_numbers = #tpu.dot_dimension_numbers<[1], [0], [0], [1], [0, 0, 1, 1], [], []>} : vector<1x32xf32>, vector<32x96xf32>, vector<1x96xf32> -> vector<1x96xf32>
    %18 = arith.addf %17, %4 : vector<1x96xf32>
    %19 = vector.extract_strided_slice %15 {offsets = [0, 0], sizes = [1, 64], strides = [1, 1]} : vector<8x96xf32> to vector<1x64xf32>
    %20 = vector.extract_strided_slice %18 {offsets = [0, 0], sizes = [1, 64], strides = [1, 1]} : vector<1x96xf32> to vector<1x64xf32>
    %21 = arith.addf %19, %20 : vector<1x64xf32>
    %22 = arith.negf %21 : vector<1x64xf32>
    %23 = math.exp %22 : vector<1x64xf32>
    %cst_9 = arith.constant 1.000000e+00 : f32
    %24 = vector.broadcast %cst_9 : f32 to vector<1x64xf32>
    %25 = arith.addf %24, %23 : vector<1x64xf32>
    %26 = arith.divf %24, %25 : vector<1x64xf32>
    %27 = vector.extract_strided_slice %26 {offsets = [0, 0], sizes = [1, 32], strides = [1, 1]} : vector<1x64xf32> to vector<1x32xf32>
    %28 = vector.extract_strided_slice %26 {offsets = [0, 32], sizes = [1, 32], strides = [1, 1]} : vector<1x64xf32> to vector<1x32xf32>
    %29 = vector.extract_strided_slice %15 {offsets = [0, 64], sizes = [1, 32], strides = [1, 1]} : vector<8x96xf32> to vector<1x32xf32>
    %30 = vector.extract_strided_slice %18 {offsets = [0, 64], sizes = [1, 32], strides = [1, 1]} : vector<1x96xf32> to vector<1x32xf32>
    %31 = arith.mulf %27, %30 : vector<1x32xf32>
    %32 = arith.addf %29, %31 : vector<1x32xf32>
    %33 = math.tanh %32 : vector<1x32xf32>
    %cst_10 = arith.constant 1.000000e+00 : f32
    %34 = vector.broadcast %cst_10 : f32 to vector<1x32xf32>
    %35 = arith.subf %34, %28 : vector<1x32xf32>
    %36 = arith.mulf %35, %33 : vector<1x32xf32>
    %37 = arith.mulf %28, %16 : vector<1x32xf32>
    %38 = arith.addf %36, %37 : vector<1x32xf32>
    %c0_11 = arith.constant 0 : index
    %c0_12 = arith.constant 0 : index
    %39 = vector.load %arg2[%c0_11, %c0_12] : memref<8x32xf32, #tpu.memory_space<vmem>>, vector<1x32xf32>
    tpu.vector_store %arg2[%c0_11, %c0_12], %38 {strides = array<i32>} : memref<8x32xf32, #tpu.memory_space<vmem>>, vector<1x32xf32>,
    %cst_13 = arith.constant dense<0.000000e+00> : vector<1x96xf32>
    %40 = tpu.matmul %38, %1, %cst_13 {dimension_numbers = #tpu.dot_dimension_numbers<[1], [0], [0], [1], [0, 0, 1, 1], [], []>} : vector<1x32xf32>, vector<32x96xf32>, vector<1x96xf32> -> vector<1x96xf32>
    %41 = arith.addf %40, %4 : vector<1x96xf32>
    %42 = vector.extract_strided_slice %15 {offsets = [1, 0], sizes = [1, 64], strides = [1, 1]} : vector<8x96xf32> to vector<1x64xf32>
    %43 = vector.extract_strided_slice %41 {offsets = [0, 0], sizes = [1, 64], strides = [1, 1]} : vector<1x96xf32> to vector<1x64xf32>
    %44 = arith.addf %42, %43 : vector<1x64xf32>
    %45 = arith.negf %44 : vector<1x64xf32>
    %46 = math.exp %45 : vector<1x64xf32>
    %cst_14 = arith.constant 1.000000e+00 : f32
    %47 = vector.broadcast %cst_14 : f32 to vector<1x64xf32>
    %48 = arith.addf %47, %46 : vector<1x64xf32>
    %49 = arith.divf %47, %48 : vector<1x64xf32>
    %50 = vector.extract_strided_slice %49 {offsets = [0, 0], sizes = [1, 32], strides = [1, 1]} : vector<1x64xf32> to vector<1x32xf32>
    %51 = vector.extract_strided_slice %49 {offsets = [0, 32], sizes = [1, 32], strides = [1, 1]} : vector<1x64xf32> to vector<1x32xf32>
    %52 = vector.extract_strided_slice %15 {offsets = [1, 64], sizes = [1, 32], strides = [1, 1]} : vector<8x96xf32> to vector<1x32xf32>
    %53 = vector.extract_strided_slice %41 {offsets = [0, 64], sizes = [1, 32], strides = [1, 1]} : vector<1x96xf32> to vector<1x32xf32>
    %54 = arith.mulf %50, %53 : vector<1x32xf32>
    %55 = arith.addf %52, %54 : vector<1x32xf32>
    %56 = math.tanh %55 : vector<1x32xf32>
    %cst_15 = arith.constant 1.000000e+00 : f32
    %57 = vector.broadcast %cst_15 : f32 to vector<1x32xf32>
    %58 = arith.subf %57, %51 : vector<1x32xf32>
    %59 = arith.mulf %58, %56 : vector<1x32xf32>
    %60 = arith.mulf %51, %38 : vector<1x32xf32>
    %61 = arith.addf %59, %60 : vector<1x32xf32>
    %c1 = arith.constant 1 : index
    %c0_16 = arith.constant 0 : index
    %62 = vector.load %arg2[%c1, %c0_16] : memref<8x32xf32, #tpu.memory_space<vmem>>, vector<1x32xf32>
    tpu.vector_store %arg2[%c1, %c0_16], %61 {strides = array<i32>} : memref<8x32xf32, #tpu.memory_space<vmem>>, vector<1x32xf32>,
    %cst_17 = arith.constant dense<0.000000e+00> : vector<1x96xf32>
    %63 = tpu.matmul %61, %1, %cst_17 {dimension_numbers = #tpu.dot_dimension_numbers<[1], [0], [0], [1], [0, 0, 1, 1], [], []>} : vector<1x32xf32>, vector<32x96xf32>, vector<1x96xf32> -> vector<1x96xf32>
    %64 = arith.addf %63, %4 : vector<1x96xf32>
    %65 = vector.extract_strided_slice %15 {offsets = [2, 0], sizes = [1, 64], strides = [1, 1]} : vector<8x96xf32> to vector<1x64xf32>
    %66 = vector.extract_strided_slice %64 {offsets = [0, 0], sizes = [1, 64], strides = [1, 1]} : vector<1x96xf32> to vector<1x64xf32>
    %67 = arith.addf %65, %66 : vector<1x64xf32>
    %68 = arith.negf %67 : vector<1x64xf32>
    %69 = math.exp %68 : vector<1x64xf32>
    %cst_18 = arith.constant 1.000000e+00 : f32
    %70 = vector.broadcast %cst_18 : f32 to vector<1x64xf32>
    %71 = arith.addf %70, %69 : vector<1x64xf32>
    %72 = arith.divf %70, %71 : vector<1x64xf32>
    %73 = vector.extract_strided_slice %72 {offsets = [0, 0], sizes = [1, 32], strides = [1, 1]} : vector<1x64xf32> to vector<1x32xf32>
    %74 = vector.extract_strided_slice %72 {offsets = [0, 32], sizes = [1, 32], strides = [1, 1]} : vector<1x64xf32> to vector<1x32xf32>
    %75 = vector.extract_strided_slice %15 {offsets = [2, 64], sizes = [1, 32], strides = [1, 1]} : vector<8x96xf32> to vector<1x32xf32>
    %76 = vector.extract_strided_slice %64 {offsets = [0, 64], sizes = [1, 32], strides = [1, 1]} : vector<1x96xf32> to vector<1x32xf32>
    %77 = arith.mulf %73, %76 : vector<1x32xf32>
    %78 = arith.addf %75, %77 : vector<1x32xf32>
    %79 = math.tanh %78 : vector<1x32xf32>
    %cst_19 = arith.constant 1.000000e+00 : f32
    %80 = vector.broadcast %cst_19 : f32 to vector<1x32xf32>
    %81 = arith.subf %80, %74 : vector<1x32xf32>
    %82 = arith.mulf %81, %79 : vector<1x32xf32>
    %83 = arith.mulf %74, %61 : vector<1x32xf32>
    %84 = arith.addf %82, %83 : vector<1x32xf32>
    %c2 = arith.constant 2 : index
    %c0_20 = arith.constant 0 : index
    %85 = vector.load %arg2[%c2, %c0_20] : memref<8x32xf32, #tpu.memory_space<vmem>>, vector<1x32xf32>
    tpu.vector_store %arg2[%c2, %c0_20], %84 {strides = array<i32>} : memref<8x32xf32, #tpu.memory_space<vmem>>, vector<1x32xf32>,
    %cst_21 = arith.constant dense<0.000000e+00> : vector<1x96xf32>
    %86 = tpu.matmul %84, %1, %cst_21 {dimension_numbers = #tpu.dot_dimension_numbers<[1], [0], [0], [1], [0, 0, 1, 1], [], []>} : vector<1x32xf32>, vector<32x96xf32>, vector<1x96xf32> -> vector<1x96xf32>
    %87 = arith.addf %86, %4 : vector<1x96xf32>
    %88 = vector.extract_strided_slice %15 {offsets = [3, 0], sizes = [1, 64], strides = [1, 1]} : vector<8x96xf32> to vector<1x64xf32>
    %89 = vector.extract_strided_slice %87 {offsets = [0, 0], sizes = [1, 64], strides = [1, 1]} : vector<1x96xf32> to vector<1x64xf32>
    %90 = arith.addf %88, %89 : vector<1x64xf32>
    %91 = arith.negf %90 : vector<1x64xf32>
    %92 = math.exp %91 : vector<1x64xf32>
    %cst_22 = arith.constant 1.000000e+00 : f32
    %93 = vector.broadcast %cst_22 : f32 to vector<1x64xf32>
    %94 = arith.addf %93, %92 : vector<1x64xf32>
    %95 = arith.divf %93, %94 : vector<1x64xf32>
    %96 = vector.extract_strided_slice %95 {offsets = [0, 0], sizes = [1, 32], strides = [1, 1]} : vector<1x64xf32> to vector<1x32xf32>
    %97 = vector.extract_strided_slice %95 {offsets = [0, 32], sizes = [1, 32], strides = [1, 1]} : vector<1x64xf32> to vector<1x32xf32>
    %98 = vector.extract_strided_slice %15 {offsets = [3, 64], sizes = [1, 32], strides = [1, 1]} : vector<8x96xf32> to vector<1x32xf32>
    %99 = vector.extract_strided_slice %87 {offsets = [0, 64], sizes = [1, 32], strides = [1, 1]} : vector<1x96xf32> to vector<1x32xf32>
    %100 = arith.mulf %96, %99 : vector<1x32xf32>
    %101 = arith.addf %98, %100 : vector<1x32xf32>
    %102 = math.tanh %101 : vector<1x32xf32>
    %cst_23 = arith.constant 1.000000e+00 : f32
    %103 = vector.broadcast %cst_23 : f32 to vector<1x32xf32>
    %104 = arith.subf %103, %97 : vector<1x32xf32>
    %105 = arith.mulf %104, %102 : vector<1x32xf32>
    %106 = arith.mulf %97, %84 : vector<1x32xf32>
    %107 = arith.addf %105, %106 : vector<1x32xf32>
    %c3 = arith.constant 3 : index
    %c0_24 = arith.constant 0 : index
    %108 = vector.load %arg2[%c3, %c0_24] : memref<8x32xf32, #tpu.memory_space<vmem>>, vector<1x32xf32>
    tpu.vector_store %arg2[%c3, %c0_24], %107 {strides = array<i32>} : memref<8x32xf32, #tpu.memory_space<vmem>>, vector<1x32xf32>,
    %cst_25 = arith.constant dense<0.000000e+00> : vector<1x96xf32>
    %109 = tpu.matmul %107, %1, %cst_25 {dimension_numbers = #tpu.dot_dimension_numbers<[1], [0], [0], [1], [0, 0, 1, 1], [], []>} : vector<1x32xf32>, vector<32x96xf32>, vector<1x96xf32> -> vector<1x96xf32>
    %110 = arith.addf %109, %4 : vector<1x96xf32>
    %111 = vector.extract_strided_slice %15 {offsets = [4, 0], sizes = [1, 64], strides = [1, 1]} : vector<8x96xf32> to vector<1x64xf32>
    %112 = vector.extract_strided_slice %110 {offsets = [0, 0], sizes = [1, 64], strides = [1, 1]} : vector<1x96xf32> to vector<1x64xf32>
    %113 = arith.addf %111, %112 : vector<1x64xf32>
    %114 = arith.negf %113 : vector<1x64xf32>
    %115 = math.exp %114 : vector<1x64xf32>
    %cst_26 = arith.constant 1.000000e+00 : f32
    %116 = vector.broadcast %cst_26 : f32 to vector<1x64xf32>
    %117 = arith.addf %116, %115 : vector<1x64xf32>
    %118 = arith.divf %116, %117 : vector<1x64xf32>
    %119 = vector.extract_strided_slice %118 {offsets = [0, 0], sizes = [1, 32], strides = [1, 1]} : vector<1x64xf32> to vector<1x32xf32>
    %120 = vector.extract_strided_slice %118 {offsets = [0, 32], sizes = [1, 32], strides = [1, 1]} : vector<1x64xf32> to vector<1x32xf32>
    %121 = vector.extract_strided_slice %15 {offsets = [4, 64], sizes = [1, 32], strides = [1, 1]} : vector<8x96xf32> to vector<1x32xf32>
    %122 = vector.extract_strided_slice %110 {offsets = [0, 64], sizes = [1, 32], strides = [1, 1]} : vector<1x96xf32> to vector<1x32xf32>
    %123 = arith.mulf %119, %122 : vector<1x32xf32>
    %124 = arith.addf %121, %123 : vector<1x32xf32>
    %125 = math.tanh %124 : vector<1x32xf32>
    %cst_27 = arith.constant 1.000000e+00 : f32
    %126 = vector.broadcast %cst_27 : f32 to vector<1x32xf32>
    %127 = arith.subf %126, %120 : vector<1x32xf32>
    %128 = arith.mulf %127, %125 : vector<1x32xf32>
    %129 = arith.mulf %120, %107 : vector<1x32xf32>
    %130 = arith.addf %128, %129 : vector<1x32xf32>
    %c4 = arith.constant 4 : index
    %c0_28 = arith.constant 0 : index
    %131 = vector.load %arg2[%c4, %c0_28] : memref<8x32xf32, #tpu.memory_space<vmem>>, vector<1x32xf32>
    tpu.vector_store %arg2[%c4, %c0_28], %130 {strides = array<i32>} : memref<8x32xf32, #tpu.memory_space<vmem>>, vector<1x32xf32>,
    %cst_29 = arith.constant dense<0.000000e+00> : vector<1x96xf32>
    %132 = tpu.matmul %130, %1, %cst_29 {dimension_numbers = #tpu.dot_dimension_numbers<[1], [0], [0], [1], [0, 0, 1, 1], [], []>} : vector<1x32xf32>, vector<32x96xf32>, vector<1x96xf32> -> vector<1x96xf32>
    %133 = arith.addf %132, %4 : vector<1x96xf32>
    %134 = vector.extract_strided_slice %15 {offsets = [5, 0], sizes = [1, 64], strides = [1, 1]} : vector<8x96xf32> to vector<1x64xf32>
    %135 = vector.extract_strided_slice %133 {offsets = [0, 0], sizes = [1, 64], strides = [1, 1]} : vector<1x96xf32> to vector<1x64xf32>
    %136 = arith.addf %134, %135 : vector<1x64xf32>
    %137 = arith.negf %136 : vector<1x64xf32>
    %138 = math.exp %137 : vector<1x64xf32>
    %cst_30 = arith.constant 1.000000e+00 : f32
    %139 = vector.broadcast %cst_30 : f32 to vector<1x64xf32>
    %140 = arith.addf %139, %138 : vector<1x64xf32>
    %141 = arith.divf %139, %140 : vector<1x64xf32>
    %142 = vector.extract_strided_slice %141 {offsets = [0, 0], sizes = [1, 32], strides = [1, 1]} : vector<1x64xf32> to vector<1x32xf32>
    %143 = vector.extract_strided_slice %141 {offsets = [0, 32], sizes = [1, 32], strides = [1, 1]} : vector<1x64xf32> to vector<1x32xf32>
    %144 = vector.extract_strided_slice %15 {offsets = [5, 64], sizes = [1, 32], strides = [1, 1]} : vector<8x96xf32> to vector<1x32xf32>
    %145 = vector.extract_strided_slice %133 {offsets = [0, 64], sizes = [1, 32], strides = [1, 1]} : vector<1x96xf32> to vector<1x32xf32>
    %146 = arith.mulf %142, %145 : vector<1x32xf32>
    %147 = arith.addf %144, %146 : vector<1x32xf32>
    %148 = math.tanh %147 : vector<1x32xf32>
    %cst_31 = arith.constant 1.000000e+00 : f32
    %149 = vector.broadcast %cst_31 : f32 to vector<1x32xf32>
    %150 = arith.subf %149, %143 : vector<1x32xf32>
    %151 = arith.mulf %150, %148 : vector<1x32xf32>
    %152 = arith.mulf %143, %130 : vector<1x32xf32>
    %153 = arith.addf %151, %152 : vector<1x32xf32>
    %c5 = arith.constant 5 : index
    %c0_32 = arith.constant 0 : index
    %154 = vector.load %arg2[%c5, %c0_32] : memref<8x32xf32, #tpu.memory_space<vmem>>, vector<1x32xf32>
    tpu.vector_store %arg2[%c5, %c0_32], %153 {strides = array<i32>} : memref<8x32xf32, #tpu.memory_space<vmem>>, vector<1x32xf32>,
    %cst_33 = arith.constant dense<0.000000e+00> : vector<1x96xf32>
    %155 = tpu.matmul %153, %1, %cst_33 {dimension_numbers = #tpu.dot_dimension_numbers<[1], [0], [0], [1], [0, 0, 1, 1], [], []>} : vector<1x32xf32>, vector<32x96xf32>, vector<1x96xf32> -> vector<1x96xf32>
    %156 = arith.addf %155, %4 : vector<1x96xf32>
    %157 = vector.extract_strided_slice %15 {offsets = [6, 0], sizes = [1, 64], strides = [1, 1]} : vector<8x96xf32> to vector<1x64xf32>
    %158 = vector.extract_strided_slice %156 {offsets = [0, 0], sizes = [1, 64], strides = [1, 1]} : vector<1x96xf32> to vector<1x64xf32>
    %159 = arith.addf %157, %158 : vector<1x64xf32>
    %160 = arith.negf %159 : vector<1x64xf32>
    %161 = math.exp %160 : vector<1x64xf32>
    %cst_34 = arith.constant 1.000000e+00 : f32
    %162 = vector.broadcast %cst_34 : f32 to vector<1x64xf32>
    %163 = arith.addf %162, %161 : vector<1x64xf32>
    %164 = arith.divf %162, %163 : vector<1x64xf32>
    %165 = vector.extract_strided_slice %164 {offsets = [0, 0], sizes = [1, 32], strides = [1, 1]} : vector<1x64xf32> to vector<1x32xf32>
    %166 = vector.extract_strided_slice %164 {offsets = [0, 32], sizes = [1, 32], strides = [1, 1]} : vector<1x64xf32> to vector<1x32xf32>
    %167 = vector.extract_strided_slice %15 {offsets = [6, 64], sizes = [1, 32], strides = [1, 1]} : vector<8x96xf32> to vector<1x32xf32>
    %168 = vector.extract_strided_slice %156 {offsets = [0, 64], sizes = [1, 32], strides = [1, 1]} : vector<1x96xf32> to vector<1x32xf32>
    %169 = arith.mulf %165, %168 : vector<1x32xf32>
    %170 = arith.addf %167, %169 : vector<1x32xf32>
    %171 = math.tanh %170 : vector<1x32xf32>
    %cst_35 = arith.constant 1.000000e+00 : f32
    %172 = vector.broadcast %cst_35 : f32 to vector<1x32xf32>
    %173 = arith.subf %172, %166 : vector<1x32xf32>
    %174 = arith.mulf %173, %171 : vector<1x32xf32>
    %175 = arith.mulf %166, %153 : vector<1x32xf32>
    %176 = arith.addf %174, %175 : vector<1x32xf32>
    %c6 = arith.constant 6 : index
    %c0_36 = arith.constant 0 : index
    %177 = vector.load %arg2[%c6, %c0_36] : memref<8x32xf32, #tpu.memory_space<vmem>>, vector<1x32xf32>
    tpu.vector_store %arg2[%c6, %c0_36], %176 {strides = array<i32>} : memref<8x32xf32, #tpu.memory_space<vmem>>, vector<1x32xf32>,
    %cst_37 = arith.constant dense<0.000000e+00> : vector<1x96xf32>
    %178 = tpu.matmul %176, %1, %cst_37 {dimension_numbers = #tpu.dot_dimension_numbers<[1], [0], [0], [1], [0, 0, 1, 1], [], []>} : vector<1x32xf32>, vector<32x96xf32>, vector<1x96xf32> -> vector<1x96xf32>
    %179 = arith.addf %178, %4 : vector<1x96xf32>
    %180 = vector.extract_strided_slice %15 {offsets = [7, 0], sizes = [1, 64], strides = [1, 1]} : vector<8x96xf32> to vector<1x64xf32>
    %181 = vector.extract_strided_slice %179 {offsets = [0, 0], sizes = [1, 64], strides = [1, 1]} : vector<1x96xf32> to vector<1x64xf32>
    %182 = arith.addf %180, %181 : vector<1x64xf32>
    %183 = arith.negf %182 : vector<1x64xf32>
    %184 = math.exp %183 : vector<1x64xf32>
    %cst_38 = arith.constant 1.000000e+00 : f32
    %185 = vector.broadcast %cst_38 : f32 to vector<1x64xf32>
    %186 = arith.addf %185, %184 : vector<1x64xf32>
    %187 = arith.divf %185, %186 : vector<1x64xf32>
    %188 = vector.extract_strided_slice %187 {offsets = [0, 0], sizes = [1, 32], strides = [1, 1]} : vector<1x64xf32> to vector<1x32xf32>
    %189 = vector.extract_strided_slice %187 {offsets = [0, 32], sizes = [1, 32], strides = [1, 1]} : vector<1x64xf32> to vector<1x32xf32>
    %190 = vector.extract_strided_slice %15 {offsets = [7, 64], sizes = [1, 32], strides = [1, 1]} : vector<8x96xf32> to vector<1x32xf32>
    %191 = vector.extract_strided_slice %179 {offsets = [0, 64], sizes = [1, 32], strides = [1, 1]} : vector<1x96xf32> to vector<1x32xf32>
    %192 = arith.mulf %188, %191 : vector<1x32xf32>
    %193 = arith.addf %190, %192 : vector<1x32xf32>
    %194 = math.tanh %193 : vector<1x32xf32>
    %cst_39 = arith.constant 1.000000e+00 : f32
    %195 = vector.broadcast %cst_39 : f32 to vector<1x32xf32>
    %196 = arith.subf %195, %189 : vector<1x32xf32>
    %197 = arith.mulf %196, %194 : vector<1x32xf32>
    %198 = arith.mulf %189, %176 : vector<1x32xf32>
    %199 = arith.addf %197, %198 : vector<1x32xf32>
    %c7 = arith.constant 7 : index
    %c0_40 = arith.constant 0 : index
    %200 = vector.load %arg2[%c7, %c0_40] : memref<8x32xf32, #tpu.memory_space<vmem>>, vector<1x32xf32>
    tpu.vector_store %arg2[%c7, %c0_40], %199 {strides = array<i32>} : memref<8x32xf32, #tpu.memory_space<vmem>>, vector<1x32xf32>,
    return
  }
}

</mosaic_0001>

<bundles_post_ra>
// kernel: tpu_custom_call.1
= control target key start
LH: loop header
LB: loop body
LE: loop exit
PB: predicated region body
PF: predicated region fallthrough
CT: control target
= control target key end

     0   :  { %7 = vsyncpa [#allocation3], 0  ;;  %s957_s0 = inlined_call_operand.vmem [shape: f32[8,4], index: 0, kind: input, shape index: {}]   ;;  %s958_s1 = inlined_call_operand.hbm [shape: f32[72,96], index: 1, kind: input, shape index: {}]   ;;  %s959_s2 = inlined_call_operand.hbm [shape: f32[8,32], index: 2, kind: output, shape index: {}]  }
   0x1   :  { %8 = vsyncpa [#allocation4], 0  ;;  %s15_s11 = sshll.u32 %s958_s1, 4  ;;  %s821_s12 = smov [#allocation2]   ;;  %s16_s11 = int_to_ptr.hbm [resolvable:$true] %s15_s11 }
   0x2   :  { %s17_s13 = sshll.u32 %s821_s12, 4  ;;  %s822_s14 = smov 128   ;;  %s18_s13 = int_to_ptr.vmem [resolvable:$true] %s17_s13 }
   0x3   :  { %s823_s15 = smov 8  }
   0x4   :  { %23 = dma.hbm_to_vmem [thread:$0]  %s16_s11, 1152, %s18_s13, [#allocation3], %s822_s14, %s822_s14, %s823_s15  }
   0x5   :  { %817 = dma.done.wait [#allocation3], 1152  }
   0x6   :  { %818 = vsyncadd [#allocation3], 4294966144  ;;  %v846_v0 = vld [vmem:[#allocation2 + $0x40] sm:$0xff]  ;;  %vm45_vm0 = vcmask 1043456   ;;  %v35_v1 = vld [vmem:[#allocation2 + $0x38] sm:$0xff]  ;;  %vm41_vm1 = vcmask 31744  }
   0x7   :  { %v40_v2 = vrot.slane %v846_v0, 2  ;;  %v37_v3 = vld [vmem:[%s957_s0] sm:$0xff]  ;;  %111 = vmatpush.msra.mxu2 %v35_v1  ;;  %v34_v4 = vld [vmem:[#allocation2 + $0x30] sm:$0xff]  ;;  %178 = vmatpush.msra.mxu3 %v35_v1  ;;  %v33_v5 = vld [vmem:[#allocation2 + $0x28] sm:$0xff]  ;;  %v824_v8 = vmov 0.0   ;;  %v38_v12 = vperm.slane %v846_v0, 6 }
   0x8   :  { %v31_v6 = vld [vmem:[#allocation2 + $0x18] sm:$0xff]  ;;  %v32_v7 = vld [vmem:[#allocation2 + $0x20] sm:$0xff]  ;;  %v30_v9 = vld [vmem:[#allocation2 + $0x10] sm:$0xff]  ;;  %vm70_vm2 = vcmask 261120   ;;  %v855_v16 = vrot.slane %v846_v0, 1  ;;  %s825_s0 = smov 64  }
   0x9   :  { %696 = vmatpush.msk.msra.mxu0 %vm45_vm0, %v40_v2  ;;  %112 = vmatpush.msra.mxu2 %v34_v4  ;;  %v29_v10 = vld [vmem:[#allocation2 + $0x8] sm:$0xff]  ;;  %v28_v11 = vld [vmem:[#allocation2] sm:$0xff]  ;;  %v69_v19 = vperm.slane %v846_v0, 0  ;;  %s826_s1 = smov 96   ;;  %vm162_vm7 = vcmask 253952   ;;  %s827_s18 = smov [#allocation5]  }
   0xa   :  { %697 = vmatmul.msk.f32.vlgmr.msra.gmra.mxu0 %vm41_vm1, %v37_v3  ;;  %86 = vmatpush.msra.mxu1 %v31_v6  ;;  %s684_s19 = sshll.u32 %s827_s18, 4  ;;  %s686_s22 = sshll.u32 %s959_s2, 4  ;;  %s685_s19 = int_to_ptr.vmem [resolvable:$true] %s684_s19  ;;  %s687_s22 = int_to_ptr.hbm [resolvable:$true] %s686_s22 }
   0xb   :  { %113 = vmatpush.msra.mxu2 %v33_v5  ;;  %179 = vmatpush.msra.mxu3 %v34_v4 }
   0xc   :  { %252 = vmatpush.msrb.mxu0 %v35_v1  ;;  %87 = vmatpush.msra.mxu1 %v30_v9 }
   0xd   :  { %114 = vmatpush.msra.mxu2 %v32_v7  ;;  %180 = vmatpush.msra.mxu3 %v33_v5 }
   0xe   :  { %115 = vmatmul.f32.vlgmr.msra.gmra.mxu2 %v824_v8  ;;  %253 = vmatpush.msrb.mxu0 %v34_v4 }
   0xf   :  { %181 = vmatpush.msra.mxu3 %v32_v7  ;;  %400 = vmatpush.msrb.mxu2 %v35_v1 }
  0x10   :  { %254 = vmatpush.msrb.mxu0 %v33_v5  ;;  %88 = vmatpush.msra.mxu1 %v29_v10 }
  0x11   :  { %474 = vmatpush.msrb.mxu3 %v35_v1  ;;  %401 = vmatpush.msrb.mxu2 %v34_v4 }
  0x12   :  { %255 = vmatpush.msrb.mxu0 %v32_v7  ;;  %89 = vmatpush.msra.mxu1 %v28_v11 }
  0x13   :  { %475 = vmatpush.msrb.mxu3 %v34_v4  ;;  %402 = vmatpush.msrb.mxu2 %v33_v5 }
  0x14   :  { %548 = vmatpush.msra.mxu0 %v35_v1  ;;  %326 = vmatpush.msrb.mxu1 %v35_v1 }
  0x15   :  { %476 = vmatpush.msrb.mxu3 %v33_v5  ;;  %403 = vmatpush.msrb.mxu2 %v32_v7 }
  0x16   :  { %549 = vmatpush.msra.mxu0 %v34_v4  ;;  %327 = vmatpush.msrb.mxu1 %v34_v4 }
  0x17   :  { %477 = vmatpush.msrb.mxu3 %v32_v7 }
  0x18   :  { %550 = vmatpush.msra.mxu0 %v33_v5  ;;  %328 = vmatpush.msrb.mxu1 %v33_v5 }
  0x1a   :  { %551 = vmatpush.msra.mxu0 %v32_v7  ;;  %329 = vmatpush.msrb.mxu1 %v32_v7 }
  0x87   :  { %v65_v13 = vpop.f32.mrf.mxu0 }
  0x88   :  { %v66_v14 = vadd.f32 %v65_v13, %v38_v12 }
  0x8a   :  { %v68_v15 = vmax.f32 %v66_v14, 0.0 }
  0x8c   :  { %698 = vmatmul.msk.f32.vlgmr.msra.gmra.mxu1 %vm70_vm2, %v68_v15 }
  0x8d   :  { %622 = vmatpush.msra.mxu1 %v35_v1 }
  0x8f   :  { %623 = vmatpush.msra.mxu1 %v34_v4 }
  0x91   :  { %v116_v17 = vpop.f32.mrf.mxu2  ;;  %624 = vmatpush.msra.mxu1 %v33_v5 }
  0x92   :  { %v117_v18 = vadd.f32 %v116_v17, %v855_v16 }
  0x93   :  { %625 = vmatpush.msra.mxu1 %v32_v7 }
  0x94   :  { %140 = vrot.lane.b32.xlu0 %v117_v18, %s825_s0 }
 0x106   :  { %v141_v33 = vpop.permute.xlu0 %140 }
 0x109   :  { %v91_v20 = vpop.f32.mrf.mxu1 }
 0x10a   :  { %v860_v21 = vadd.f32 %v91_v20, %v69_v19 }
 0x10c   :  { %v119_v22 = vadd.f32 %v117_v18, %v860_v21 }
 0x10e   :  { %v699_v23 = vmul.f32 -1.442695, %v119_v22 }
 0x110   :  { %721 = vpow2.f32 %v699_v23 }
 0x116   :  { %v722_v24 = vpop.eup %721 }
 0x117   :  { %v123_v25 = vadd.f32 1.0, %v722_v24 }
 0x119   :  { %723 = vrcp.f32 %v123_v25  ;;  %v135_v29 = vand.u32 2147483648, %v123_v25  ;;  %v133_v31 = vand.u32 2147483647, %v123_v25  ;;  %vm129_vm4 = vweird.f32 %v123_v25 }
 0x11b   :  { %v136_v34 = vor.u32 1.1754944e-38, %v135_v29  ;;  %vm134_vm6 = vcmp.eq.f32.partialorder %v133_v31, 8.507059e+37 }
 0x11f   :  { %v724_v26 = vpop.eup %723 }
 0x120   :  { %v125_v27 = vmul.f32 %v724_v26, %v123_v25  ;;  %vm130_vm3 = vweird.f32 %v724_v26 }
 0x121   :  { %vm131_vm5 = vmor %vm129_vm4, %vm130_vm3 }
 0x122   :  { %v126_v28 = vsub.f32 1.0, %v125_v27 }
 0x124   :  { %v127_v30 = vmul.f32 %v724_v26, %v126_v28 }
 0x126   :  { %v128_v32 = vadd.f32 %v724_v26, %v127_v30 }
 0x128   :  { %v132_v35 = vsel %vm131_vm5, %v724_v26, %v128_v32 }
 0x129   :  { %v137_v36 = vsel %vm134_vm6, %v136_v34, %v132_v35 }
 0x12a   :  { %v143_v37 = vmul.f32 %v141_v33, %v137_v36  ;;  %v150_v41 = vsub.f32 1.0, %v137_v36  ;;  %v156_v43 = vmul.f32 0.0, %v137_v36 }
 0x12c   :  { %145 = vrot.lane.b32.xlu0 %v143_v37, %s825_s0 }
 0x19e   :  { %v146_v38 = vpop.permute.xlu0 %145 }
 0x19f   :  { %v148_v39 = vadd.f32 %v146_v38, %v860_v21 }
 0x1a1   :  { %725 = vtanh.f32 %v148_v39 }
 0x1a7   :  { %v726_v40 = vpop.eup %725 }
 0x1a8   :  { %152 = vrot.lane.b32.xlu1 %v726_v40, %s826_s1 }
 0x21a   :  { %v153_v42 = vpop.permute.xlu1 %152 }
 0x21b   :  { %v155_v44 = vmul.f32 %v153_v42, %v150_v41 }
 0x21d   :  { %v157_v45 = vadd.f32 %v156_v43, %v155_v44 }
 0x21f   :  { %159 = vrot.lane.b32.xlu1 %v157_v45, %s826_s1  ;;  %v225_v62 = vrot.slane %v157_v45, 7 }
 0x291   :  { %v160_v46 = vpop.permute.xlu1 %159 }
 0x292   :  { %163 = vst.msk [vmem:[#allocation5] sm:$0x1] %vm162_vm7, %v160_v46  ;;  %700 = vmatmul.msk.f32.vlgmr.msra.gmra.mxu3 %vm70_vm2, %v160_v46 }
 0x315   :  { %v183_v47 = vpop.f32.mrf.mxu3 }
 0x316   :  { %v184_v48 = vadd.f32 %v183_v47, %v855_v16 }
 0x318   :  { %v187_v49 = vrot.slane %v184_v48, 7 }
 0x31a   :  { %v189_v50 = vadd.f32 %v187_v49, %v860_v21  ;;  %209 = vrot.lane.b32.xlu2 %v187_v49, %s825_s0 }
 0x31c   :  { %v701_v51 = vmul.f32 -1.442695, %v189_v50 }
 0x31e   :  { %727 = vpow2.f32 %v701_v51 }
 0x324   :  { %v728_v52 = vpop.eup %727 }
 0x325   :  { %v193_v53 = vadd.f32 1.0, %v728_v52 }
 0x327   :  { %729 = vrcp.f32 %v193_v53  ;;  %v205_v57 = vand.u32 2147483648, %v193_v53  ;;  %v203_v59 = vand.u32 2147483647, %v193_v53  ;;  %vm199_vm9 = vweird.f32 %v193_v53 }
 0x329   :  { %v206_v61 = vor.u32 1.1754944e-38, %v205_v57  ;;  %vm204_vm11 = vcmp.eq.f32.partialorder %v203_v59, 8.507059e+37 }
 0x32d   :  { %v730_v54 = vpop.eup %729 }
 0x32e   :  { %v195_v55 = vmul.f32 %v730_v54, %v193_v53  ;;  %vm200_vm8 = vweird.f32 %v730_v54 }
 0x32f   :  { %vm201_vm10 = vmor %vm199_vm9, %vm200_vm8 }
 0x330   :  { %v196_v56 = vsub.f32 1.0, %v195_v55 }
 0x332   :  { %v197_v58 = vmul.f32 %v730_v54, %v196_v56 }
 0x334   :  { %v198_v60 = vadd.f32 %v730_v54, %v197_v58 }
 0x336   :  { %v202_v63 = vsel %vm201_vm10, %v730_v54, %v198_v60 }
 0x337   :  { %v207_v0 = vsel %vm204_vm11, %v206_v61, %v202_v63 }
 0x338   :  { %v227_v1 = vmul.f32 %v225_v62, %v207_v0  ;;  %v219_v7 = vsub.f32 1.0, %v207_v0 }
 0x374   :  { %v210_v2 = vpop.permute.xlu2 %209 }
 0x375   :  { %v212_v3 = vmul.f32 %v210_v2, %v207_v0 }
 0x377   :  { %214 = vrot.lane.b32.xlu2 %v212_v3, %s825_s0 }
 0x3d1   :  { %v215_v4 = vpop.permute.xlu2 %214 }
 0x3d2   :  { %v217_v5 = vadd.f32 %v215_v4, %v860_v21 }
 0x3d4   :  { %731 = vtanh.f32 %v217_v5 }
 0x3da   :  { %v732_v6 = vpop.eup %731 }
 0x3db   :  { %221 = vrot.lane.b32.xlu0 %v732_v6, %s826_s1 }
 0x44d   :  { %v222_v8 = vpop.permute.xlu0 %221 }
 0x44e   :  { %v224_v9 = vmul.f32 %v222_v8, %v219_v7 }
 0x450   :  { %v874_v10 = vadd.f32 %v227_v1, %v224_v9 }
 0x452   :  { %v235_v11 = vrot.slane %v874_v10, 1  ;;  %v299_v38 = vrot.slane %v874_v10, 7 }
 0x454   :  { %236 = vrot.lane.b32.xlu1 %v235_v11, %s826_s1 }
 0x4c6   :  { %v237_v12 = vpop.permute.xlu1 %236 }
 0x4c7   :  { %702 = vmatmul.msk.f32.vlgmr.msrb.gmra.mxu0 %vm70_vm2, %v237_v12 }
 0x544   :  { %v257_v13 = vpop.f32.mrf.mxu0 }
 0x545   :  { %v258_v14 = vadd.f32 %v257_v13, %v855_v16 }
 0x547   :  { %v261_v15 = vrot.slane %v258_v14, 6 }
 0x549   :  { %283 = vrot.lane.b32.xlu2 %v261_v15, %s825_s0  ;;  %v263_v17 = vadd.f32 %v261_v15, %v860_v21 }
 0x54b   :  { %v703_v18 = vmul.f32 -1.442695, %v263_v17 }
 0x54d   :  { %733 = vpow2.f32 %v703_v18 }
 0x553   :  { %v734_v19 = vpop.eup %733 }
 0x554   :  { %v267_v20 = vadd.f32 1.0, %v734_v19 }
 0x556   :  { %735 = vrcp.f32 %v267_v20  ;;  %v279_v27 = vand.u32 2147483648, %v267_v20  ;;  %vm273_vm13 = vweird.f32 %v267_v20  ;;  %v277_v28 = vand.u32 2147483647, %v267_v20 }
 0x558   :  { %v280_v30 = vor.u32 1.1754944e-38, %v279_v27  ;;  %vm278_vm15 = vcmp.eq.f32.partialorder %v277_v28, 8.507059e+37 }
 0x55c   :  { %v736_v22 = vpop.eup %735 }
 0x55d   :  { %v269_v23 = vmul.f32 %v736_v22, %v267_v20  ;;  %vm274_vm12 = vweird.f32 %v736_v22 }
 0x55e   :  { %vm275_vm14 = vmor %vm273_vm13, %vm274_vm12 }
 0x55f   :  { %v270_v24 = vsub.f32 1.0, %v269_v23 }
 0x561   :  { %v271_v25 = vmul.f32 %v736_v22, %v270_v24 }
 0x563   :  { %v272_v26 = vadd.f32 %v736_v22, %v271_v25 }
 0x565   :  { %v276_v29 = vsel %vm275_vm14, %v736_v22, %v272_v26 }
 0x566   :  { %v281_v32 = vsel %vm278_vm15, %v280_v30, %v276_v29 }
 0x567   :  { %v293_v37 = vsub.f32 1.0, %v281_v32  ;;  %v301_v40 = vmul.f32 %v299_v38, %v281_v32 }
 0x5a3   :  { %v284_v31 = vpop.permute.xlu2 %283 }
 0x5a4   :  { %v286_v33 = vmul.f32 %v284_v31, %v281_v32 }
 0x5a6   :  { %288 = vrot.lane.b32.xlu0 %v286_v33, %s825_s0 }
 0x618   :  { %v289_v34 = vpop.permute.xlu0 %288 }
 0x619   :  { %v291_v35 = vadd.f32 %v289_v34, %v860_v21 }
 0x61b   :  { %737 = vtanh.f32 %v291_v35 }
 0x621   :  { %v738_v36 = vpop.eup %737 }
 0x622   :  { %295 = vrot.lane.b32.xlu1 %v738_v36, %s826_s1 }
 0x694   :  { %v296_v39 = vpop.permute.xlu1 %295 }
 0x695   :  { %v298_v41 = vmul.f32 %v296_v39, %v293_v37 }
 0x697   :  { %v886_v42 = vadd.f32 %v301_v40, %v298_v41 }
 0x699   :  { %v309_v43 = vrot.slane %v886_v42, 2  ;;  %v373_v4 = vrot.slane %v886_v42, 7 }
 0x69b   :  { %310 = vrot.lane.b32.xlu2 %v309_v43, %s826_s1 }
 0x6f5   :  { %v311_v44 = vpop.permute.xlu2 %310 }
 0x6f6   :  { %704 = vmatmul.msk.f32.vlgmr.msrb.gmra.mxu1 %vm70_vm2, %v311_v44 }
 0x773   :  { %v331_v45 = vpop.f32.mrf.mxu1 }
 0x774   :  { %v332_v46 = vadd.f32 %v331_v45, %v855_v16 }
 0x776   :  { %v335_v47 = vrot.slane %v332_v46, 5 }
 0x778   :  { %357 = vrot.lane.b32.xlu0 %v335_v47, %s825_s0  ;;  %v337_v48 = vadd.f32 %v335_v47, %v860_v21 }
 0x77a   :  { %v705_v49 = vmul.f32 -1.442695, %v337_v48 }
 0x77c   :  { %739 = vpow2.f32 %v705_v49 }
 0x782   :  { %v740_v50 = vpop.eup %739 }
 0x783   :  { %v341_v51 = vadd.f32 1.0, %v740_v50 }
 0x785   :  { %741 = vrcp.f32 %v341_v51  ;;  %v353_v57 = vand.u32 2147483648, %v341_v51  ;;  %vm347_vm1 = vweird.f32 %v341_v51  ;;  %v351_v58 = vand.u32 2147483647, %v341_v51 }
 0x787   :  { %v354_v60 = vor.u32 1.1754944e-38, %v353_v57  ;;  %vm352_vm4 = vcmp.eq.f32.partialorder %v351_v58, 8.507059e+37 }
 0x78b   :  { %v742_v52 = vpop.eup %741 }
 0x78c   :  { %v343_v53 = vmul.f32 %v742_v52, %v341_v51  ;;  %vm348_vm0 = vweird.f32 %v742_v52 }
 0x78d   :  { %vm349_vm3 = vmor %vm347_vm1, %vm348_vm0 }
 0x78e   :  { %v344_v54 = vsub.f32 1.0, %v343_v53 }
 0x790   :  { %v345_v55 = vmul.f32 %v742_v52, %v344_v54 }
 0x792   :  { %v346_v56 = vadd.f32 %v742_v52, %v345_v55 }
 0x794   :  { %v350_v59 = vsel %vm349_vm3, %v742_v52, %v346_v56 }
 0x795   :  { %v355_v62 = vsel %vm352_vm4, %v354_v60, %v350_v59 }
 0x796   :  { %v367_v3 = vsub.f32 1.0, %v355_v62  ;;  %v375_v6 = vmul.f32 %v373_v4, %v355_v62 }
 0x7ea   :  { %v358_v61 = vpop.permute.xlu0 %357 }
 0x7eb   :  { %v360_v63 = vmul.f32 %v358_v61, %v355_v62 }
 0x7ed   :  { %362 = vrot.lane.b32.xlu1 %v360_v63, %s825_s0 }
 0x85f   :  { %v363_v0 = vpop.permute.xlu1 %362 }
 0x860   :  { %v365_v1 = vadd.f32 %v363_v0, %v860_v21 }
 0x862   :  { %743 = vtanh.f32 %v365_v1 }
 0x868   :  { %v744_v2 = vpop.eup %743 }
 0x869   :  { %369 = vrot.lane.b32.xlu2 %v744_v2, %s826_s1 }
 0x8c3   :  { %v370_v5 = vpop.permute.xlu2 %369 }
 0x8c4   :  { %v372_v7 = vmul.f32 %v370_v5, %v367_v3 }
 0x8c6   :  { %v898_v8 = vadd.f32 %v375_v6, %v372_v7 }
 0x8c8   :  { %v383_v9 = vrot.slane %v898_v8, 3  ;;  %v447_v37 = vrot.slane %v898_v8, 7 }
 0x8ca   :  { %384 = vrot.lane.b32.xlu0 %v383_v9, %s826_s1 }
 0x93c   :  { %v385_v11 = vpop.permute.xlu0 %384 }
 0x93d   :  { %706 = vmatmul.msk.f32.vlgmr.msrb.gmra.mxu2 %vm70_vm2, %v385_v11 }
 0x9c0   :  { %v405_v12 = vpop.f32.mrf.mxu2 }
 0x9c1   :  { %v406_v13 = vadd.f32 %v405_v12, %v855_v16 }
 0x9c3   :  { %v409_v14 = vrot.slane %v406_v13, 4 }
 0x9c5   :  { %431 = vrot.lane.b32.xlu1 %v409_v14, %s825_s0  ;;  %v411_v15 = vadd.f32 %v409_v14, %v860_v21 }
 0x9c7   :  { %v707_v17 = vmul.f32 -1.442695, %v411_v15 }
 0x9c9   :  { %745 = vpow2.f32 %v707_v17 }
 0x9cf   :  { %v746_v18 = vpop.eup %745 }
 0x9d0   :  { %v415_v19 = vadd.f32 1.0, %v746_v18 }
 0x9d2   :  { %747 = vrcp.f32 %v415_v19  ;;  %v427_v26 = vand.u32 2147483648, %v415_v19  ;;  %vm421_vm6 = vweird.f32 %v415_v19  ;;  %v425_v27 = vand.u32 2147483647, %v415_v19 }
 0x9d4   :  { %v428_v29 = vor.u32 1.1754944e-38, %v427_v26  ;;  %vm426_vm8 = vcmp.eq.f32.partialorder %v425_v27, 8.507059e+37 }
 0x9d8   :  { %v748_v20 = vpop.eup %747 }
 0x9d9   :  { %v417_v22 = vmul.f32 %v748_v20, %v415_v19  ;;  %vm422_vm5 = vweird.f32 %v748_v20 }
 0x9da   :  { %vm423_vm7 = vmor %vm421_vm6, %vm422_vm5  ;;  %vm233_vm5 = vcmask 254977   ;;  %vm455_vm6 = vcmask 258052  }
 0x9db   :  { %v418_v23 = vsub.f32 1.0, %v417_v22 }
 0x9dd   :  { %v419_v24 = vmul.f32 %v748_v20, %v418_v23 }
 0x9df   :  { %v420_v25 = vadd.f32 %v748_v20, %v419_v24 }
 0x9e1   :  { %v424_v28 = vsel %vm423_vm7, %v748_v20, %v420_v25  ;;  %vm307_vm7 = vcmask 256002  }
 0x9e2   :  { %v429_v31 = vsel %vm426_vm8, %v428_v29, %v424_v28  ;;  %vm529_vm8 = vcmask 259077  }
 0x9e3   :  { %v441_v36 = vsub.f32 1.0, %v429_v31  ;;  %v449_v39 = vmul.f32 %v447_v37, %v429_v31 }
 0xa37   :  { %v432_v30 = vpop.permute.xlu1 %431 }
 0xa38   :  { %v434_v32 = vmul.f32 %v432_v30, %v429_v31 }
 0xa3a   :  { %436 = vrot.lane.b32.xlu2 %v434_v32, %s825_s0 }
 0xa94   :  { %v437_v33 = vpop.permute.xlu2 %436 }
 0xa95   :  { %v439_v34 = vadd.f32 %v437_v33, %v860_v21 }
 0xa97   :  { %749 = vtanh.f32 %v439_v34 }
 0xa9d   :  { %v750_v35 = vpop.eup %749 }
 0xa9e   :  { %443 = vrot.lane.b32.xlu0 %v750_v35, %s826_s1 }
 0xb10   :  { %v444_v38 = vpop.permute.xlu0 %443 }
 0xb11   :  { %v446_v40 = vmul.f32 %v444_v38, %v441_v36 }
 0xb13   :  { %v910_v41 = vadd.f32 %v449_v39, %v446_v40 }
 0xb15   :  { %v457_v43 = vrot.slane %v910_v41, 4  ;;  %v521_v4 = vrot.slane %v910_v41, 7 }
 0xb17   :  { %458 = vrot.lane.b32.xlu1 %v457_v43, %s826_s1 }
 0xb89   :  { %v459_v44 = vpop.permute.xlu1 %458 }
 0xb8a   :  { %708 = vmatmul.msk.f32.vlgmr.msrb.gmra.mxu3 %vm70_vm2, %v459_v44 }
 0xc0d   :  { %v479_v45 = vpop.f32.mrf.mxu3 }
 0xc0e   :  { %v480_v46 = vadd.f32 %v479_v45, %v855_v16 }
 0xc10   :  { %v483_v47 = vrot.slane %v480_v46, 3 }
 0xc12   :  { %505 = vrot.lane.b32.xlu2 %v483_v47, %s825_s0  ;;  %v485_v48 = vadd.f32 %v483_v47, %v860_v21 }
 0xc14   :  { %v709_v49 = vmul.f32 -1.442695, %v485_v48 }
 0xc16   :  { %751 = vpow2.f32 %v709_v49 }
 0xc1c   :  { %v752_v50 = vpop.eup %751 }
 0xc1d   :  { %v489_v51 = vadd.f32 1.0, %v752_v50 }
 0xc1f   :  { %753 = vrcp.f32 %v489_v51  ;;  %v501_v57 = vand.u32 2147483648, %v489_v51  ;;  %vm495_vm10 = vweird.f32 %v489_v51  ;;  %v499_v58 = vand.u32 2147483647, %v489_v51 }
 0xc21   :  { %v502_v60 = vor.u32 1.1754944e-38, %v501_v57  ;;  %vm500_vm12 = vcmp.eq.f32.partialorder %v499_v58, 8.507059e+37 }
 0xc25   :  { %v754_v52 = vpop.eup %753 }
 0xc26   :  { %v491_v53 = vmul.f32 %v754_v52, %v489_v51  ;;  %vm496_vm9 = vweird.f32 %v754_v52 }
 0xc27   :  { %vm497_vm11 = vmor %vm495_vm10, %vm496_vm9  ;;  %vm381_vm9 = vcmask 257027   ;;  %vm603_vm10 = vcmask 260102  }
 0xc28   :  { %v492_v54 = vsub.f32 1.0, %v491_v53 }
 0xc2a   :  { %v493_v55 = vmul.f32 %v754_v52, %v492_v54 }
 0xc2c   :  { %v494_v56 = vadd.f32 %v754_v52, %v493_v55 }
 0xc2e   :  { %v498_v59 = vsel %vm497_vm11, %v754_v52, %v494_v56  ;;  %vm677_vm11 = vcmask 261127  }
 0xc2f   :  { %v503_v62 = vsel %vm500_vm12, %v502_v60, %v498_v59 }
 0xc30   :  { %v515_v3 = vsub.f32 1.0, %v503_v62  ;;  %v523_v6 = vmul.f32 %v521_v4, %v503_v62 }
 0xc6c   :  { %v506_v61 = vpop.permute.xlu2 %505 }
 0xc6d   :  { %v508_v63 = vmul.f32 %v506_v61, %v503_v62 }
 0xc6f   :  { %510 = vrot.lane.b32.xlu0 %v508_v63, %s825_s0 }
 0xce1   :  { %v511_v0 = vpop.permute.xlu0 %510 }
 0xce2   :  { %v513_v1 = vadd.f32 %v511_v0, %v860_v21 }
 0xce4   :  { %755 = vtanh.f32 %v513_v1 }
 0xcea   :  { %v756_v2 = vpop.eup %755 }
 0xceb   :  { %517 = vrot.lane.b32.xlu1 %v756_v2, %s826_s1 }
 0xd5d   :  { %v518_v5 = vpop.permute.xlu1 %517 }
 0xd5e   :  { %v520_v7 = vmul.f32 %v518_v5, %v515_v3 }
 0xd60   :  { %v922_v9 = vadd.f32 %v523_v6, %v520_v7 }
 0xd62   :  { %v531_v11 = vrot.slane %v922_v9, 5  ;;  %v595_v38 = vrot.slane %v922_v9, 7 }
 0xd64   :  { %532 = vrot.lane.b32.xlu2 %v531_v11, %s826_s1 }
 0xdbe   :  { %v533_v12 = vpop.permute.xlu2 %532 }
 0xdbf   :  { %710 = vmatmul.msk.f32.vlgmr.msra.gmra.mxu0 %vm70_vm2, %v533_v12 }
 0xe3c   :  { %v553_v13 = vpop.f32.mrf.mxu0 }
 0xe3d   :  { %v554_v14 = vadd.f32 %v553_v13, %v855_v16 }
 0xe3f   :  { %v557_v15 = vrot.slane %v554_v14, 2 }
 0xe41   :  { %579 = vrot.lane.b32.xlu0 %v557_v15, %s825_s0  ;;  %v559_v17 = vadd.f32 %v557_v15, %v860_v21 }
 0xe43   :  { %v711_v18 = vmul.f32 -1.442695, %v559_v17 }
 0xe45   :  { %757 = vpow2.f32 %v711_v18 }
 0xe4b   :  { %v758_v19 = vpop.eup %757 }
 0xe4c   :  { %v563_v20 = vadd.f32 1.0, %v758_v19 }
 0xe4e   :  { %759 = vrcp.f32 %v563_v20  ;;  %v575_v27 = vand.u32 2147483648, %v563_v20  ;;  %vm569_vm14 = vweird.f32 %v563_v20  ;;  %v573_v28 = vand.u32 2147483647, %v563_v20 }
 0xe50   :  { %v576_v30 = vor.u32 1.1754944e-38, %v575_v27  ;;  %vm574_vm0 = vcmp.eq.f32.partialorder %v573_v28, 8.507059e+37 }
 0xe54   :  { %v760_v22 = vpop.eup %759 }
 0xe55   :  { %v565_v23 = vmul.f32 %v760_v22, %v563_v20  ;;  %vm570_vm13 = vweird.f32 %v760_v22 }
 0xe56   :  { %vm571_vm15 = vmor %vm569_vm14, %vm570_vm13 }
 0xe57   :  { %v566_v24 = vsub.f32 1.0, %v565_v23 }
 0xe59   :  { %v567_v25 = vmul.f32 %v760_v22, %v566_v24 }
 0xe5b   :  { %v568_v26 = vadd.f32 %v760_v22, %v567_v25 }
 0xe5d   :  { %v572_v29 = vsel %vm571_vm15, %v760_v22, %v568_v26 }
 0xe5e   :  { %v577_v32 = vsel %vm574_vm0, %v576_v30, %v572_v29 }
 0xe5f   :  { %v589_v37 = vsub.f32 1.0, %v577_v32  ;;  %v597_v40 = vmul.f32 %v595_v38, %v577_v32 }
 0xeb3   :  { %v580_v31 = vpop.permute.xlu0 %579 }
 0xeb4   :  { %v582_v33 = vmul.f32 %v580_v31, %v577_v32 }
 0xeb6   :  { %584 = vrot.lane.b32.xlu1 %v582_v33, %s825_s0 }
 0xf28   :  { %v585_v34 = vpop.permute.xlu1 %584 }
 0xf29   :  { %v587_v35 = vadd.f32 %v585_v34, %v860_v21 }
 0xf2b   :  { %761 = vtanh.f32 %v587_v35 }
 0xf31   :  { %v762_v36 = vpop.eup %761 }
 0xf32   :  { %591 = vrot.lane.b32.xlu2 %v762_v36, %s826_s1 }
 0xf8c   :  { %v592_v39 = vpop.permute.xlu2 %591 }
 0xf8d   :  { %v594_v43 = vmul.f32 %v592_v39, %v589_v37 }
 0xf8f   :  { %v598_v44 = vadd.f32 %v597_v40, %v594_v43 }
 0xf91   :  { %v605_v45 = vrot.slane %v598_v44, 6  ;;  %v669_v6 = vrot.slane %v598_v44, 7 }
 0xf93   :  { %606 = vrot.lane.b32.xlu0 %v605_v45, %s826_s1 }
0x1005   :  { %v607_v46 = vpop.permute.xlu0 %606 }
0x1006   :  { %712 = vmatmul.msk.f32.vlgmr.msra.gmra.mxu1 %vm70_vm2, %v607_v46 }
0x1083   :  { %v627_v47 = vpop.f32.mrf.mxu1 }
0x1084   :  { %v628_v48 = vadd.f32 %v627_v47, %v855_v16 }
0x1086   :  { %v631_v49 = vrot.slane %v628_v48, 1 }
0x1088   :  { %653 = vrot.lane.b32.xlu1 %v631_v49, %s825_s0  ;;  %v633_v50 = vadd.f32 %v631_v49, %v860_v21 }
0x108a   :  { %v713_v51 = vmul.f32 -1.442695, %v633_v50 }
0x108c   :  { %763 = vpow2.f32 %v713_v51 }
0x1090   :  { %230 = vrot.lane.b32.xlu1 %v874_v10, %s826_s1 }
0x1092   :  { %v764_v52 = vpop.eup %763 }
0x1093   :  { %v637_v53 = vadd.f32 1.0, %v764_v52 }
0x1095   :  { %765 = vrcp.f32 %v637_v53  ;;  %v649_v58 = vand.u32 2147483648, %v637_v53  ;;  %vm643_vm1 = vweird.f32 %v637_v53  ;;  %v647_v59 = vand.u32 2147483647, %v637_v53 }
0x1097   :  { %v650_v60 = vor.u32 1.1754944e-38, %v649_v58  ;;  %vm648_vm4 = vcmp.eq.f32.partialorder %v647_v59, 8.507059e+37 }
0x1098   :  { %452 = vrot.lane.b32.xlu1 %v910_v41, %s826_s1 }
0x109b   :  { %v766_v54 = vpop.eup %765 }
0x109c   :  { %v639_v55 = vmul.f32 %v766_v54, %v637_v53  ;;  %vm644_vm2 = vweird.f32 %v766_v54 }
0x109d   :  { %vm645_vm3 = vmor %vm643_vm1, %vm644_vm2 }
0x109e   :  { %v640_v56 = vsub.f32 1.0, %v639_v55 }
0x10a0   :  { %v641_v16 = vmul.f32 %v766_v54, %v640_v56 }
0x10a2   :  { %v642_v57 = vadd.f32 %v766_v54, %v641_v16 }
0x10a4   :  { %v646_v10 = vsel %vm645_vm3, %v766_v54, %v642_v57 }
0x10a5   :  { %v651_v61 = vsel %vm648_vm4, %v650_v60, %v646_v10 }
0x10fa   :  { %v654_v41 = vpop.permute.xlu1 %653 }
0x10fb   :  { %v656_v62 = vmul.f32 %v654_v41, %v651_v61 }
0x10fd   :  { %658 = vrot.lane.b32.xlu2 %v656_v62, %s825_s0 }
0x1102   :  { %v231_v63 = vpop.permute.xlu1 %230 }
0x1103   :  { %234 = vst.msk [vmem:[#allocation5] sm:$0x2] %vm233_vm5, %v231_v63 }
0x1105   :  { %304 = vrot.lane.b32.xlu2 %v886_v42, %s826_s1  ;;  %v663_v42 = vsub.f32 1.0, %v651_v61 }
0x110a   :  { %v453_v0 = vpop.permute.xlu1 %452 }
0x110b   :  { %456 = vst.msk [vmem:[#allocation5] sm:$0x10] %vm455_vm6, %v453_v0 }
0x110d   :  { %526 = vrot.lane.b32.xlu2 %v922_v9, %s826_s1  ;;  %v671_v9 = vmul.f32 %v669_v6, %v651_v61 }
0x1157   :  { %v659_v1 = vpop.permute.xlu2 %658 }
0x1158   :  { %v661_v2 = vadd.f32 %v659_v1, %v860_v21 }
0x115a   :  { %767 = vtanh.f32 %v661_v2 }
0x115f   :  { %v305_v3 = vpop.permute.xlu2 %304 }
0x1160   :  { %v768_v4 = vpop.eup %767  ;;  %308 = vst.msk [vmem:[#allocation5] sm:$0x4] %vm307_vm7, %v305_v3 }
0x1161   :  { %665 = vrot.lane.b32.xlu0 %v768_v4, %s826_s1 }
0x1167   :  { %v527_v5 = vpop.permute.xlu2 %526 }
0x1168   :  { %530 = vst.msk [vmem:[#allocation5] sm:$0x20] %vm529_vm8, %v527_v5 }
0x1169   :  { %378 = vrot.lane.b32.xlu0 %v898_v8, %s826_s1 }
0x1171   :  { %600 = vrot.lane.b32.xlu0 %v598_v44, %s826_s1 }
0x11d3   :  { %v666_v7 = vpop.permute.xlu0 %665 }
0x11d4   :  { %v668_v21 = vmul.f32 %v666_v7, %v663_v42 }
0x11d6   :  { %v672_v11 = vadd.f32 %v671_v9, %v668_v21 }
0x11d8   :  { %674 = vrot.lane.b32.xlu1 %v672_v11, %s826_s1 }
0x11db   :  { %v379_v12 = vpop.permute.xlu0 %378 }
0x11dc   :  { %382 = vst.msk [vmem:[#allocation5] sm:$0x8] %vm381_vm9, %v379_v12 }
0x11e3   :  { %v601_v13 = vpop.permute.xlu0 %600 }
0x11e4   :  { %604 = vst.msk [vmem:[#allocation5] sm:$0x40] %vm603_vm10, %v601_v13 }
0x124a   :  { %v675_v8 = vpop.permute.xlu1 %674 }
0x124b   :  { %678 = vst.msk [vmem:[#allocation5] sm:$0x80] %vm677_vm11, %v675_v8 }
0x124c   :  { %689 = dma.vmem_to_hbm [thread:$0]  %s685_s19, 128, %s687_s22, [#allocation4]  }
0x124d   :  { %819 = dma.done.wait [#allocation4], 128  }
0x124e   :  { %820 = vsyncadd [#allocation4], 4294967168 }
0x124f   :  { %694 = vsyncpa [#allocation3], 1 }
0x1250   :  { %695 = vsyncpa [#allocation4], 1 }

</bundles_post_ra>
